<compile_context>
chip_gen: v5e
topology: v5e:2x2
jax: 0.10.0
libtpu: 0.0.40
codegen_flags: <defaults>
</compile_context>

<pallas_src>
import functools

import jax
import jax.numpy as jnp
from jax import lax
from jax.experimental import pallas as pl
from jax.experimental.pallas import tpu as pltpu


# --------------------------------------------------------------------------
# planning helpers
# --------------------------------------------------------------------------
def _vmem_capacity_bytes():
    """Physical VMEM per core; conservative 64 MiB (v7x) fallback."""
    try:
        info = pltpu.get_tpu_info()
        cap = getattr(info, "vmem_capacity_bytes", None)
        if cap:
            return int(cap)
    except Exception:
        pass
    return 64 * 1024 * 1024


def _plan_tiling(N, C, hidden, HW, x_dtype, w_dtype):
    dsize = jnp.dtype(x_dtype).itemsize
    wsize = jnp.dtype(w_dtype).itemsize
    cap = _vmem_capacity_bytes()

    # Working budget: ~45% of physical VMEM, capped at 48 MiB
    # (=> ~28 MiB on v7x's 64 MiB, 48 MiB on v5e/v6e's 128 MiB).
    budget = int(min(cap * 0.45, 48 * 1024 * 1024))
    budget = max(budget, 8 * 1024 * 1024)

    # Batch tile: a divisor of N, <= 8, leaving >= 2 batch grid steps whenever
    # N >= 2 so the "parallel" axis shards across both v7x TensorCores.
    block_n = 1
    if N >= 2:
        for d in range(1, min(8, N // 2) + 1):
            if N % d == 0:
                block_n = d
    else:
        block_n = max(N, 1)

    weights_bytes = 2 * C * hidden * wsize

    # Spatial tile: target a 2-16 MiB double-buffered streaming x tile.
    per_tile_cap = 16 * 1024 * 1024
    avail = budget - 2 * weights_bytes - (2 * 1024 * 1024)
    per_tile = min(per_tile_cap, max(avail // 2, 1 * 1024 * 1024))
    row_bytes = block_n * C * dsize                 # bytes per spatial lane
    max_lanes = max(per_tile // row_bytes, 128)

    if HW <= max_lanes:
        # Whole spatial extent in one step: contiguous DMA, no tail masking.
        block_hw = HW
    else:
        block_hw = (max_lanes // 128) * 128
        # Prefer an exact divisor (multiple of 128) nearby to avoid masking.
        lo = max(128, block_hw // 2)
        d = block_hw
        while d >= lo:
            if HW % d == 0:
                block_hw = d
                break
            d -= 128

    needs_mask = (HW % block_hw) != 0

    # Lane width of the elementwise (VALU) accumulators kept in VMEM scratch.
    scratch_cap = 8 * 1024 * 1024
    if block_hw <= 128:
        acc_w = block_hw
    else:
        acc_w = 128
        for cand in (512, 256):
            if block_hw % cand == 0 and 2 * block_n * C * cand * 4 <= scratch_cap:
                acc_w = cand
                break
    acc_w = min(acc_w, block_hw)

    # VMEM limit derived from the actual buffers (+ slack), capped below cap.
    x_tile_bytes = block_n * C * block_hw * dsize
    scratch_bytes = 2 * block_n * C * acc_w * 4
    out_bytes = 2 * block_n * C * dsize
    needed = (2 * x_tile_bytes + scratch_bytes + 2 * weights_bytes
              + out_bytes + 2 * 1024 * 1024)
    vmem_limit = int(min(cap * 0.9, max(needed + 4 * 1024 * 1024,
                                        32 * 1024 * 1024)))

    return block_n, block_hw, acc_w, needs_mask, vmem_limit


# --------------------------------------------------------------------------
# kernel
# --------------------------------------------------------------------------
def _accum_chunk(x_ref, svec_ref, mvec_ref, *, start, width, acc_w,
                 base, hw_total, needs_mask):
    """Elementwise-accumulate one lane chunk into the VMEM vector accumulators."""
    block_n, c, _ = x_ref.shape
    xs = x_ref[:, :, pl.ds(start, width)].astype(jnp.float32)
    if needs_mask:
        lane = lax.broadcasted_iota(jnp.int32, (block_n, c, width), 2)
        valid = (base + start + lane) < hw_total
        xs_s = jnp.where(valid, xs, jnp.float32(0.0))
        xs_m = jnp.where(valid, xs, jnp.float32(-jnp.inf))
    else:
        xs_s = xs
        xs_m = xs
    if width == acc_w:
        svec_ref[...] = svec_ref[...] + xs_s
        mvec_ref[...] = jnp.maximum(mvec_ref[...], xs_m)
    else:  # static remainder chunk (only when block_hw is not 128-aligned)
        svec_ref[:, :, :width] = svec_ref[:, :, :width] + xs_s
        mvec_ref[:, :, :width] = jnp.maximum(mvec_ref[:, :, :width], xs_m)


def _channel_attention_kernel(x_ref, w1t_ref, w2t_ref, o_ref,
                              svec_ref, mvec_ref, *,
                              hw_total, block_hw, acc_w, needs_mask, unroll):
    """Fused ChannelAttention forward.

    x_ref   : (block_n, C, block_hw)   streaming spatial chunk of the input
    w1t_ref : (C, hidden)              fc1 weight, pre-transposed
    w2t_ref : (hidden, C)              fc2 weight, pre-transposed
    o_ref   : (block_n, 1, C)          sigmoid(mlp(avg) + mlp(max))
    svec_ref: (block_n, C, acc_w) f32  elementwise running sum   (VMEM scratch)
    mvec_ref: (block_n, C, acc_w) f32  elementwise running max   (VMEM scratch)
    """
    k = pl.program_id(1)                      # spatial (reduction) grid axis
    n_k = pl.num_programs(1)

    # ---- prologue: reset accumulators at the start of each batch tile ----
    @pl.when(k == 0)
    def _init():
        svec_ref[...] = jnp.zeros_like(svec_ref)
        mvec_ref[...] = jnp.full_like(mvec_ref, -jnp.inf)

    n_full = block_hw // acc_w
    rem = block_hw - n_full * acc_w
    base = k * block_hw                       # global lane offset of this tile

    acc = functools.partial(_accum_chunk, x_ref, svec_ref, mvec_ref,
                            acc_w=acc_w, base=base, hw_total=hw_total,
                            needs_mask=needs_mask)

    # ---- hot loop: pure VALU accumulation, no cross-lane reductions ----
    if n_full == 1:
        acc(start=0, width=acc_w)
    elif n_full > 1:
        def body(i, carry):
            start = pl.multiple_of(i * acc_w, acc_w)
            acc(start=start, width=acc_w)
            return carry
        lax.fori_loop(0, n_full, body, 0, unroll=min(n_full, unroll))

    if rem > 0:                               # static remainder (odd HW)
        acc(start=n_full * acc_w, width=rem)

    # ---- epilogue: one XLU reduce + tiny MLP + sigmoid per batch tile ----
    @pl.when(k == n_k - 1)
    def _finish():
        inv_hw = jnp.float32(1.0 / hw_total)  # compile-time constant
        avg = jnp.sum(svec_ref[...], axis=-1) * inv_hw     # (block_n, C)
        mx = jnp.max(mvec_ref[...], axis=-1)                # (block_n, C)
        w1t = w1t_ref[...].astype(jnp.float32)
        w2t = w2t_ref[...].astype(jnp.float32)

        def mlp(v):
            h = jnp.dot(v, w1t, preferred_element_type=jnp.float32)
            h = jnp.maximum(h, 0.0)
            return jnp.dot(h, w2t, preferred_element_type=jnp.float32)

        out = jax.nn.sigmoid(mlp(avg) + mlp(mx))
        o_ref[...] = out[:, None, :].astype(o_ref.dtype)


# --------------------------------------------------------------------------
# wrapper
# --------------------------------------------------------------------------
def channel_attention(x_nchw, w1, w2):
    """x_nchw: (N, C, H, W); w1: (hidden, C) [fc1]; w2: (C, hidden) [fc2].

    Returns (N, C, 1, 1), matching the PyTorch module's output shape.
    """
    N, C, H, W = x_nchw.shape
    HW = H * W
    hidden = w1.shape[0]
    assert w1.shape == (hidden, C) and w2.shape == (C, hidden)

    x_flat = x_nchw.reshape(N, C, HW)
    w1t = w1.T                                   # (C, hidden)
    w2t = w2.T                                   # (hidden, C)

    block_n, block_hw, acc_w, needs_mask, vmem_limit = _plan_tiling(
        N, C, hidden, HW, x_nchw.dtype, w1.dtype)
    assert N % block_n == 0

    grid = (N // block_n, pl.cdiv(HW, block_hw))   # (batch, spatial-reduction)

    kernel = functools.partial(
        _channel_attention_kernel, hw_total=HW, block_hw=block_hw,
        acc_w=acc_w, needs_mask=needs_mask, unroll=4)

    out = pl.pallas_call(
        kernel,
        out_shape=jax.ShapeDtypeStruct((N, 1, C), x_nchw.dtype),
        grid_spec=pltpu.PrefetchScalarGridSpec(
            num_scalar_prefetch=0,
            grid=grid,
            in_specs=[
                # streaming input chunks (auto double-buffered by Pallas)
                pl.BlockSpec((block_n, C, block_hw), lambda b, k: (b, 0, k)),
                # weights: constant block index -> VMEM-resident, one DMA total
                pl.BlockSpec((C, hidden), lambda b, k: (0, 0)),
                pl.BlockSpec((hidden, C), lambda b, k: (0, 0)),
            ],
            out_specs=pl.BlockSpec((block_n, 1, C), lambda b, k: (b, 0, 0)),
            scratch_shapes=[
                pltpu.VMEM((block_n, C, acc_w), jnp.float32),   # running sum
                pltpu.VMEM((block_n, C, acc_w), jnp.float32),   # running max
            ],
        ),
        compiler_params=pltpu.CompilerParams(
            dimension_semantics=("parallel", "arbitrary"),
            vmem_limit_bytes=vmem_limit,
        ),
    )(x_flat, w1t, w2t)

    return out.reshape(N, C, 1, 1)


def channel_attention_ref(x_nchw, w1, w2):
    """Pure-JAX reference mirroring the PyTorch forward exactly."""
    avg = jnp.mean(x_nchw, axis=(2, 3))          # AdaptiveAvgPool2d(1)
    mx = jnp.max(x_nchw, axis=(2, 3))            # AdaptiveMaxPool2d(1)

    def mlp(v):
        h = jnp.maximum(v @ w1.T, 0.0)           # fc1 (1x1 conv, no bias) + relu
        return h @ w2.T                          # fc2 (1x1 conv, no bias)

    out = mlp(avg) + mlp(mx)
    return jax.nn.sigmoid(out)[:, :, None, None]


# --------------------------------------------------------------------------
# self-test
# --------------------------------------------------------------------------
def _check(N, C, H, W, seed):
    hidden = C // 16                             # ratio hard-coded in the module
    key = jax.random.PRNGKey(seed)
    kx, k1, k2 = jax.random.split(key, 3)
    x = jax.random.normal(kx, (N, C, H, W), dtype=jnp.float32)
    # Conv2d 1x1 (bias=False) weights:
    #   fc1.weight: (hidden, C, 1, 1) -> (hidden, C)
    #   fc2.weight: (C, hidden, 1, 1) -> (C, hidden)
    w1 = jax.random.normal(k1, (hidden, C), dtype=jnp.float32) * 0.1
    w2 = jax.random.normal(k2, (C, hidden), dtype=jnp.float32) * 0.1

    out = jax.block_until_ready(channel_attention(x, w1, w2))
    ref = channel_attention_ref(x, w1, w2)
    assert out.shape == (N, C, 1, 1), out.shape
    assert jnp.allclose(out, ref, atol=1e-5, rtol=1e-5), (
        (N, C, H, W), float(jnp.max(jnp.abs(out - ref))))


if __name__ == "__main__":
    # 128-aligned spatial extent, >=2 batch ("parallel") grid steps.
    _check(2, 32, 32, 32, seed=0)
    # Small odd spatial extent (HW < 128): full-dim block, no alignment needed.
    _check(2, 32, 10, 10, seed=1)
    # Odd spatial extent > 128: exercises the static remainder-chunk path.
    _check(3, 32, 36, 36, seed=2)
    print("KERNEL_OK")
</pallas_src>

<mosaic_0001>
module attributes {stable_mosaic.version = 11 : i64} {
  func.func @_channel_attention_kernel(%arg0: i32, %arg1: i32, %arg2: memref<1x32x1024xf32, #tpu.memory_space<vmem>>, %arg3: memref<32x2xf32, #tpu.memory_space<vmem>>, %arg4: memref<2x32xf32, #tpu.memory_space<vmem>>, %arg5: memref<1x1x32xf32, #tpu.memory_space<vmem>>, %arg6: memref<1x32x512xf32, #tpu.memory_space<vmem>>, %arg7: memref<1x32x512xf32, #tpu.memory_space<vmem>>) attributes {dimension_semantics = [#tpu.dimension_semantics<parallel>, #tpu.dimension_semantics<arbitrary>], iteration_bounds = array<i64: 2, 1>, scalar_prefetch = 0 : i64, scratch_operands = 2 : i64, tpu.core_type = #tpu.core_type<tc>, window_params = [{transform_indices = @transform_0, window_bounds = array<i64: 1, 32, 1024>}, {pipeline_mode = #tpu.pipeline_mode<synchronous>, transform_indices = @transform_1, window_bounds = array<i64: 32, 2>}, {pipeline_mode = #tpu.pipeline_mode<synchronous>, transform_indices = @transform_2, window_bounds = array<i64: 2, 32>}, {transform_indices = @transform_3, window_bounds = array<i64: 1, 1, 32>}]} {
    %c0_i32 = arith.constant 0 : i32
    %0 = arith.cmpi eq, %arg1, %c0_i32 : i32
    %1 = arith.extui %0 : i1 to i32
    %c0_i32_0 = arith.constant 0 : i32
    %2 = arith.cmpi ne, %1, %c0_i32_0 : i32
    scf.if %2 {
      %cst = arith.constant 0.000000e+00 : f32
      %26 = vector.broadcast %cst : f32 to vector<1x32x512xf32>
      %c0_32 = arith.constant 0 : index
      %c0_33 = arith.constant 0 : index
      %c0_34 = arith.constant 0 : index
      %27 = vector.load %arg6[%c0_32, %c0_33, %c0_34] : memref<1x32x512xf32, #tpu.memory_space<vmem>>, vector<1x32x512xf32>
      tpu.vector_store %arg6[%c0_32, %c0_33, %c0_34], %26 {strides = array<i32>} : memref<1x32x512xf32, #tpu.memory_space<vmem>>, vector<1x32x512xf32>,
      %cst_35 = arith.constant 0xFF800000 : f32
      %28 = vector.broadcast %cst_35 : f32 to vector<1x32x512xf32>
      %c0_36 = arith.constant 0 : index
      %c0_37 = arith.constant 0 : index
      %c0_38 = arith.constant 0 : index
      %29 = vector.load %arg7[%c0_36, %c0_37, %c0_38] : memref<1x32x512xf32, #tpu.memory_space<vmem>>, vector<1x32x512xf32>
      tpu.vector_store %arg7[%c0_36, %c0_37, %c0_38], %28 {strides = array<i32>} : memref<1x32x512xf32, #tpu.memory_space<vmem>>, vector<1x32x512xf32>,
    } else {
    }
    %c0_i32_1 = arith.constant 0 : i32
    %c512_i32 = arith.constant 512 : i32
    %3 = arith.muli %c0_i32_1, %c512_i32 : i32
    %4 = tpu.assume_multiple %3, 512 : i32
    %c0 = arith.constant 0 : index
    %c0_2 = arith.constant 0 : index
    %5 = arith.index_cast %4 : i32 to index
    %6 = vector.load %arg2[%c0, %c0_2, %5] : memref<1x32x1024xf32, #tpu.memory_space<vmem>>, vector<1x32x512xf32>
    %c0_3 = arith.constant 0 : index
    %c0_4 = arith.constant 0 : index
    %c0_5 = arith.constant 0 : index
    %7 = vector.load %arg6[%c0_3, %c0_4, %c0_5] : memref<1x32x512xf32, #tpu.memory_space<vmem>>, vector<1x32x512xf32>
    %8 = arith.addf %7, %6 : vector<1x32x512xf32>
    %c0_6 = arith.constant 0 : index
    %c0_7 = arith.constant 0 : index
    %c0_8 = arith.constant 0 : index
    %9 = vector.load %arg6[%c0_6, %c0_7, %c0_8] : memref<1x32x512xf32, #tpu.memory_space<vmem>>, vector<1x32x512xf32>
    tpu.vector_store %arg6[%c0_6, %c0_7, %c0_8], %8 {strides = array<i32>} : memref<1x32x512xf32, #tpu.memory_space<vmem>>, vector<1x32x512xf32>,
    %c0_9 = arith.constant 0 : index
    %c0_10 = arith.constant 0 : index
    %c0_11 = arith.constant 0 : index
    %10 = vector.load %arg7[%c0_9, %c0_10, %c0_11] : memref<1x32x512xf32, #tpu.memory_space<vmem>>, vector<1x32x512xf32>
    %11 = arith.maximumf %10, %6 : vector<1x32x512xf32>
    %c0_12 = arith.constant 0 : index
    %c0_13 = arith.constant 0 : index
    %c0_14 = arith.constant 0 : index
    %12 = vector.load %arg7[%c0_12, %c0_13, %c0_14] : memref<1x32x512xf32, #tpu.memory_space<vmem>>, vector<1x32x512xf32>
    tpu.vector_store %arg7[%c0_12, %c0_13, %c0_14], %11 {strides = array<i32>} : memref<1x32x512xf32, #tpu.memory_space<vmem>>, vector<1x32x512xf32>,
    %c1_i32 = arith.constant 1 : i32
    %c512_i32_15 = arith.constant 512 : i32
    %13 = arith.muli %c1_i32, %c512_i32_15 : i32
    %14 = tpu.assume_multiple %13, 512 : i32
    %c0_16 = arith.constant 0 : index
    %c0_17 = arith.constant 0 : index
    %15 = arith.index_cast %14 : i32 to index
    %16 = vector.load %arg2[%c0_16, %c0_17, %15] : memref<1x32x1024xf32, #tpu.memory_space<vmem>>, vector<1x32x512xf32>
    %c0_18 = arith.constant 0 : index
    %c0_19 = arith.constant 0 : index
    %c0_20 = arith.constant 0 : index
    %17 = vector.load %arg6[%c0_18, %c0_19, %c0_20] : memref<1x32x512xf32, #tpu.memory_space<vmem>>, vector<1x32x512xf32>
    %18 = arith.addf %17, %16 : vector<1x32x512xf32>
    %c0_21 = arith.constant 0 : index
    %c0_22 = arith.constant 0 : index
    %c0_23 = arith.constant 0 : index
    %19 = vector.load %arg6[%c0_21, %c0_22, %c0_23] : memref<1x32x512xf32, #tpu.memory_space<vmem>>, vector<1x32x512xf32>
    tpu.vector_store %arg6[%c0_21, %c0_22, %c0_23], %18 {strides = array<i32>} : memref<1x32x512xf32, #tpu.memory_space<vmem>>, vector<1x32x512xf32>,
    %c0_24 = arith.constant 0 : index
    %c0_25 = arith.constant 0 : index
    %c0_26 = arith.constant 0 : index
    %20 = vector.load %arg7[%c0_24, %c0_25, %c0_26] : memref<1x32x512xf32, #tpu.memory_space<vmem>>, vector<1x32x512xf32>
    %21 = arith.maximumf %20, %16 : vector<1x32x512xf32>
    %c0_27 = arith.constant 0 : index
    %c0_28 = arith.constant 0 : index
    %c0_29 = arith.constant 0 : index
    %22 = vector.load %arg7[%c0_27, %c0_28, %c0_29] : memref<1x32x512xf32, #tpu.memory_space<vmem>>, vector<1x32x512xf32>
    tpu.vector_store %arg7[%c0_27, %c0_28, %c0_29], %21 {strides = array<i32>} : memref<1x32x512xf32, #tpu.memory_space<vmem>>, vector<1x32x512xf32>,
    %c2_i32 = arith.constant 2 : i32
    %c0_i32_30 = arith.constant 0 : i32
    %23 = arith.cmpi eq, %arg1, %c0_i32_30 : i32
    %24 = arith.extui %23 : i1 to i32
    %c0_i32_31 = arith.constant 0 : i32
    %25 = arith.cmpi ne, %24, %c0_i32_31 : i32
    scf.if %25 {
      %c0_32 = arith.constant 0 : index
      %c0_33 = arith.constant 0 : index
      %c0_34 = arith.constant 0 : index
      %26 = vector.load %arg6[%c0_32, %c0_33, %c0_34] : memref<1x32x512xf32, #tpu.memory_space<vmem>>, vector<1x32x512xf32>
      %cst = arith.constant dense<0.000000e+00> : vector<1x32xf32>
      %27 = vector.multi_reduction <add>, %26, %cst [2] : vector<1x32x512xf32> to vector<1x32xf32>
      %cst_35 = arith.constant 9.765625E-4 : f32
      %28 = vector.broadcast %cst_35 : f32 to vector<1x32xf32>
      %29 = arith.mulf %27, %28 : vector<1x32xf32>
      %c0_36 = arith.constant 0 : index
      %c0_37 = arith.constant 0 : index
      %c0_38 = arith.constant 0 : index
      %30 = vector.load %arg7[%c0_36, %c0_37, %c0_38] : memref<1x32x512xf32, #tpu.memory_space<vmem>>, vector<1x32x512xf32>
      %cst_39 = arith.constant dense<0xFF800000> : vector<1x32xf32>
      %31 = vector.multi_reduction <maximumf>, %30, %cst_39 [2] : vector<1x32x512xf32> to vector<1x32xf32>
      %c0_40 = arith.constant 0 : index
      %c0_41 = arith.constant 0 : index
      %32 = vector.load %arg3[%c0_40, %c0_41] : memref<32x2xf32, #tpu.memory_space<vmem>>, vector<32x2xf32>
      %c0_42 = arith.constant 0 : index
      %c0_43 = arith.constant 0 : index
      %33 = vector.load %arg4[%c0_42, %c0_43] : memref<2x32xf32, #tpu.memory_space<vmem>>, vector<2x32xf32>
      %cst_44 = arith.constant dense<0.000000e+00> : vector<1x2xf32>
      %34 = tpu.matmul %29, %32, %cst_44 {dimension_numbers = #tpu.dot_dimension_numbers<[1], [0], [0], [1], [0, 0, 1, 1], [], []>} : vector<1x32xf32>, vector<32x2xf32>, vector<1x2xf32> -> vector<1x2xf32>
      %cst_45 = arith.constant 0.000000e+00 : f32
      %35 = vector.broadcast %cst_45 : f32 to vector<1x2xf32>
      %36 = arith.maximumf %34, %35 : vector<1x2xf32>
      %cst_46 = arith.constant dense<0.000000e+00> : vector<1x32xf32>
      %37 = tpu.matmul %36, %33, %cst_46 {dimension_numbers = #tpu.dot_dimension_numbers<[1], [0], [0], [1], [0, 0, 1, 1], [], []>} : vector<1x2xf32>, vector<2x32xf32>, vector<1x32xf32> -> vector<1x32xf32>
      %cst_47 = arith.constant dense<0.000000e+00> : vector<1x2xf32>
      %38 = tpu.matmul %31, %32, %cst_47 {dimension_numbers = #tpu.dot_dimension_numbers<[1], [0], [0], [1], [0, 0, 1, 1], [], []>} : vector<1x32xf32>, vector<32x2xf32>, vector<1x2xf32> -> vector<1x2xf32>
      %cst_48 = arith.constant 0.000000e+00 : f32
      %39 = vector.broadcast %cst_48 : f32 to vector<1x2xf32>
      %40 = arith.maximumf %38, %39 : vector<1x2xf32>
      %cst_49 = arith.constant dense<0.000000e+00> : vector<1x32xf32>
      %41 = tpu.matmul %40, %33, %cst_49 {dimension_numbers = #tpu.dot_dimension_numbers<[1], [0], [0], [1], [0, 0, 1, 1], [], []>} : vector<1x2xf32>, vector<2x32xf32>, vector<1x32xf32> -> vector<1x32xf32>
      %42 = arith.addf %37, %41 : vector<1x32xf32>
      %43 = arith.negf %42 : vector<1x32xf32>
      %44 = math.exp %43 : vector<1x32xf32>
      %cst_50 = arith.constant 1.000000e+00 : f32
      %45 = vector.broadcast %cst_50 : f32 to vector<1x32xf32>
      %46 = arith.addf %45, %44 : vector<1x32xf32>
      %47 = arith.divf %45, %46 : vector<1x32xf32>
      %48 = vector.shape_cast %47 : vector<1x32xf32> to vector<1x1x32xf32>
      %c0_51 = arith.constant 0 : index
      %c0_52 = arith.constant 0 : index
      %c0_53 = arith.constant 0 : index
      %49 = vector.load %arg5[%c0_51, %c0_52, %c0_53] : memref<1x1x32xf32, #tpu.memory_space<vmem>>, vector<1x1x32xf32>
      tpu.vector_store %arg5[%c0_51, %c0_52, %c0_53], %48 {strides = array<i32>} : memref<1x1x32xf32, #tpu.memory_space<vmem>>, vector<1x1x32xf32>,
    } else {
    }
    return
  }
  func.func @transform_0(%arg0: i32, %arg1: i32) -> (i32, i32, i32) {
    %c0_i32 = arith.constant 0 : i32
    %c0_i32_0 = arith.constant 0 : i32
    return %arg0, %c0_i32, %arg1 : i32, i32, i32
  }
  func.func @transform_1(%arg0: i32, %arg1: i32) -> (i32, i32) {
    %c0_i32 = arith.constant 0 : i32
    %c0_i32_0 = arith.constant 0 : i32
    %c0_i32_1 = arith.constant 0 : i32
    return %c0_i32, %c0_i32_0 : i32, i32
  }
  func.func @transform_2(%arg0: i32, %arg1: i32) -> (i32, i32) {
    %c0_i32 = arith.constant 0 : i32
    %c0_i32_0 = arith.constant 0 : i32
    %c0_i32_1 = arith.constant 0 : i32
    return %c0_i32, %c0_i32_0 : i32, i32
  }
  func.func @transform_3(%arg0: i32, %arg1: i32) -> (i32, i32, i32) {
    %c0_i32 = arith.constant 0 : i32
    %c0_i32_0 = arith.constant 0 : i32
    %c0_i32_1 = arith.constant 0 : i32
    return %arg0, %c0_i32, %c0_i32_0 : i32, i32, i32
  }
}

</mosaic_0001>

<bundles_post_ra>
// kernel: tpu_custom_call.1
= control target key start
LH: loop header
LB: loop body
LE: loop exit
PB: predicated region body
PF: predicated region fallthrough
CT: control target
= control target key end

     0   :  { %8 = vsyncpa [#allocation5], 0  ;;  %s1226_s0 = inlined_call_operand.hbm [shape: f32[2,32,1024], index: 0, kind: input, shape index: {}]   ;;  %s1227_s1 = inlined_call_operand.vmem [shape: f32[32,2], index: 1, kind: input, shape index: {}]   ;;  %s1228_s2 = inlined_call_operand.vmem [shape: f32[2,32], index: 2, kind: input, shape index: {}]   ;;  %s1229_s3 = inlined_call_operand.hbm [shape: f32[2,1,32], index: 3, kind: output, shape index: {}]  }
   0x1   :  { %10 = vsyncpa [#allocation5 + $0x1], 0 }
   0x2   :  { %11 = vsyncpa [#allocation6], 0 }
   0x3   :  { %13 = vsyncpa [#allocation6 + $0x1], 0  ;;  %s1030_s12 = smov 0   ;;  %s1032_s13 = smov 0  }
   0x4   :  { %s1034_s14 = smov 0   ;;  %s1036_s15 = smov 0  }
   0x5   :  { %s1038_s16 = smov 0   ;;  %s1040_s17 = smov 0  }
   0x6 LB: > { %s791_s18 = sadd.s32 4294967295, %s1006_s17   ;;  %s792_s19 = sadd.s32 4294967294, %s1006_s17   ;;  %s1006_s17 = sphi %s1040_s17, %s19_s17   ;;  %s1002_s16 = sphi %s1038_s16, %s1238_s16   ;;  %s998_s15 = sphi %s1036_s15, %s1237_s15   ;;  %s994_s14 = sphi %s1034_s14, %s1236_s14   ;;  %s990_s13 = sphi %s1032_s13, %s1235_s13   ;;  %s986_s12 = sphi %s1030_s12, %s1234_s12  }
   0x7   : > { %s31_s20 = sadd.s32 1, %s1002_s16  ;;  %s40_s21 = sadd.s32 1, %s994_s14 }
   0x8   : > { %p33_p0 = scmp.ge.s32.totalorder %s31_s20, 2  ;;  %p47_p1 = scmp.ne.s32.totalorder %s994_s14, %s990_s13 }
   0x9   : > { %p48_p2 = scmp.eq.s32.totalorder %s1006_s17, 0  ;;  %p53_p3 = scmp.ne.s32.totalorder %s990_s13, %s986_s12 }
   0xa   : > { %s1240_s20 = smov (%p33_p0, %s31_s20), 0  ;;  %p54_p5 = scmp.eq.s32.totalorder %s791_s18, 0 }
   0xb   : > { %p1071_p4 = por %p48_p2, %p47_p1  ;;  %s35_s23 = ssub.s32 %s1002_s16, %s1240_s20 }
   0xc   : > { %p119_p6 = scmp.eq.s32.totalorder %s791_s18, 1  ;;  %p38_p7 = scmp.eq.s32.totalorder %s35_s23, 0 }
   0xd   : > { %p1077_p8 = por %p54_p5, %p53_p3  ;;  %p125_p10 = scmp.eq.s32.totalorder %s792_s19, 1 }
   0xe   : > { %p1081_p9 = por %p119_p6, %p47_p1  ;;  %p794_p12 = scmp.ge.s32.totalorder %s1006_s17, 2 }
   0xf   : > { %s1086_s26 = scalar_select %p38_p7, %s994_s14, %s40_s21  }
  0x10   : > { %p1088_p11 = por %p125_p10, %p53_p3  ;;  %p838_p13 = scmp.lt.s32.totalorder %s1006_s17, 2 }
  0x11   : > { %s151_s28 = sand.u32 1, %s994_s14   ;;  %s825_s30 = sshll.u32 %s1002_s16, 8 }
  0x12   : > { %s795_s29 = sshll.u32 %s151_s28, 8  ;;  %s162_s6 = scalar_lea.hbm %s1226_s0, %s825_s30 }
  0x13   : > { %s155_s7 = scalar_lea.vmem [#allocation4], %s795_s29  ;;  %s163_s9 = sshll.u32 %s162_s6, 4  ;;  %s164_s9 = int_to_ptr.hbm [resolvable:$true] %s163_s9 }
  0x14   : > { %s165_s8 = sshll.u32 %s155_s7, 4  ;;  %p831_p0 = pnand %p838_p13, %p1071_p4  ;;  %s166_s8 = int_to_ptr.vmem [resolvable:$true] %s165_s8 }
  0x15   : > { %p798_p1 = scmp.ge.s32.totalorder %s1006_s17, 1  ;;  %s152_s10 = scalar_lea.sflag [#allocation5], %s151_s28 }
  0x16   : > { %s1008_s11 = smov 1024   ;;  %s1009_s18 = smov 64  }
  0x17   : > { %833 = dma.hbm_to_vmem [thread:$0]  (!%p831_p0), %s164_s9, 4096, %s166_s8, %s152_s10, %s1008_s11, %s1008_s11, %s1009_s18  }
  0x18   : > { %p173_p2 = scmp.lt.s32.totalorder %s1006_s17, 3 }
  0x1a   : > { %p174_p3 = pnand %p798_p1, %p173_p2 }
  0x1b   : > { %s1104_s19 = sand.u32 (!%p174_p3), 1, %s990_s13  }
  0x1c   : > { %177 = sbr.rel (%p174_p3) target bundleno = 475 (0x1db), region = 32  ;;  %s799_s21 = sshll.u32 (!%p174_p3), %s1104_s19, 8 }
  0x1d   : > { %s180_s23 = scalar_lea.sflag (!%p174_p3), [#allocation5], %s1104_s19  ;;  %s1108_s29 = scalar_lea.vmem (!%p174_p3), [#allocation4], %s799_s21 }
  0x21   : > { %977 = dma.done.wait (%p1077_p8), %s180_s23, 4096  }
  0x22   : > { %979 = vsyncadd (%p1077_p8), %s180_s23, 4294963200  ;;  %v243_v0 = vld [vmem:[%s1108_s29] sm:$0xff]  ;;  %v244_v1 = vld [vmem:[%s1108_s29 + $0x8] sm:$0xff]  ;;  %vm565_vm0 = vcmask 195712   ;;  %vm561_vm1 = vcmask 130112   ;;  %vm569_vm2 = vcmask 261312   ;;  %s710_s18 = scalar_lea.hbm %s1229_s3, %s998_s15 }
  0x23   : > { %v245_v2 = vld [vmem:[%s1108_s29 + $0x10] sm:$0xff]  ;;  %v246_v3 = vld [vmem:[%s1108_s29 + $0x18] sm:$0xff]  ;;  %v800_v4 = vld [vmem:[%s1108_s29 + $0x20] sm:$0xff]  ;;  %vm571_vm3 = vcmask 261120   ;;  %vm633_vm4 = vcmask 1041408   ;;  %vm629_vm5 = vcmask 15360  }
  0x24   : > { %v801_v5 = vld [vmem:[%s1108_s29 + $0x28] sm:$0xff]  ;;  %v802_v6 = vld [vmem:[%s1108_s29 + $0x30] sm:$0xff]  ;;  %v803_v7 = vld [vmem:[%s1108_s29 + $0x38] sm:$0xff]  ;;  %v436_v8 = vmax.f32 %v243_v0, %v800_v4  ;;  %v388_v10 = vadd.f32 %v800_v4, %v243_v0  ;;  %s205_s21 = scalar_lea.vmem [#allocation7], %s1104_s19  ;;  %vm699_vm9 = vcmask 253952   ;;  %s702_s15 = scalar_lea.sflag [#allocation6], %s1104_s19 }
  0x25   : > { %v437_v9 = vmax.f32 %v244_v1, %v801_v5  ;;  %v389_v11 = vadd.f32 %v801_v5, %v244_v1  ;;  %v1123_v12 = vld [vmem:[%s1108_s29 + $0x80] sm:$0xff]  ;;  %v438_v13 = vmax.f32 %v245_v2, %v802_v6  ;;  %v390_v14 = vadd.f32 %v802_v6, %v245_v2  ;;  %v1126_v15 = vld [vmem:[%s1108_s29 + $0x88] sm:$0xff]  ;;  %v1129_v16 = vld [vmem:[%s1108_s29 + $0x90] sm:$0xff]  ;;  %s712_s23 = sshll.u32 %s205_s21, 4  ;;  %s944_s4 = scalar_lea.hbm %s1229_s3, 2  ;;  %s713_s23 = int_to_ptr.vmem [resolvable:$true] %s712_s23 }
  0x26   : > { %v1132_v17 = vld [vmem:[%s1108_s29 + $0x98] sm:$0xff]  ;;  %v439_v18 = vmax.f32 %v246_v3, %v803_v7  ;;  %v391_v20 = vadd.f32 %v803_v7, %v246_v3  ;;  %v808_v22 = vld [vmem:[%s1108_s29 + $0xa0] sm:$0xff]  ;;  %v809_v23 = vld [vmem:[%s1108_s29 + $0xa8] sm:$0xff] }
  0x27   : > { %v527_v19 = vmax.f32 %v436_v8, %v437_v9  ;;  %v487_v21 = vadd.f32 %v389_v11, %v388_v10  ;;  %v1137_v24 = vld [vmem:[%s1108_s29 + $0xb0] sm:$0xff]  ;;  %v1140_v25 = vld [vmem:[%s1108_s29 + $0xb8] sm:$0xff]  ;;  %v396_v26 = vadd.f32 %v808_v22, %v1123_v12  ;;  %v397_v27 = vadd.f32 %v809_v23, %v1126_v15  ;;  %v247_v29 = vld [vmem:[%s1108_s29 + $0x40] sm:$0xff] }
  0x28   : > { %v398_v28 = vadd.f32 %v1137_v24, %v1129_v16  ;;  %v248_v30 = vld [vmem:[%s1108_s29 + $0x48] sm:$0xff]  ;;  %v399_v33 = vadd.f32 %v1140_v25, %v1132_v17  ;;  %v249_v34 = vld [vmem:[%s1108_s29 + $0x50] sm:$0xff]  ;;  %v250_v35 = vld [vmem:[%s1108_s29 + $0x58] sm:$0xff]  ;;  %v444_v37 = vmax.f32 %v1123_v12, %v808_v22  ;;  %v445_v44 = vmax.f32 %v1126_v15, %v809_v23 }
  0x29   : > { %v528_v31 = vmax.f32 %v527_v19, %v438_v13  ;;  %v488_v32 = vadd.f32 %v487_v21, %v390_v14  ;;  %v804_v36 = vld [vmem:[%s1108_s29 + $0x60] sm:$0xff]  ;;  %v497_v38 = vadd.f32 %v397_v27, %v396_v26  ;;  %v805_v39 = vld [vmem:[%s1108_s29 + $0x68] sm:$0xff]  ;;  %v806_v40 = vld [vmem:[%s1108_s29 + $0x70] sm:$0xff]  ;;  %v446_v11 = vmax.f32 %v1129_v16, %v1137_v24 }
  0x2a   : > { %v807_v41 = vld [vmem:[%s1108_s29 + $0x78] sm:$0xff]  ;;  %v440_v42 = vmax.f32 %v247_v29, %v804_v36  ;;  %v392_v43 = vadd.f32 %v804_v36, %v247_v29  ;;  %v441_v47 = vmax.f32 %v248_v30, %v805_v39  ;;  %v442_v48 = vmax.f32 %v249_v34, %v806_v40  ;;  %v255_v49 = vld [vmem:[%s1108_s29 + $0xc0] sm:$0xff]  ;;  %v256_v50 = vld [vmem:[%s1108_s29 + $0xc8] sm:$0xff] }
  0x2b   : > { %v529_v45 = vmax.f32 %v528_v31, %v439_v18  ;;  %v489_v46 = vadd.f32 %v488_v32, %v391_v20  ;;  %v257_v51 = vld [vmem:[%s1108_s29 + $0xd0] sm:$0xff]  ;;  %v498_v52 = vadd.f32 %v497_v38, %v398_v28  ;;  %v443_v53 = vmax.f32 %v250_v35, %v807_v41  ;;  %v258_v56 = vld [vmem:[%s1108_s29 + $0xd8] sm:$0xff]  ;;  %v812_v57 = vld [vmem:[%s1108_s29 + $0xe0] sm:$0xff] }
  0x2c   : > { %v393_v54 = vadd.f32 %v805_v39, %v248_v30  ;;  %v394_v55 = vadd.f32 %v806_v40, %v249_v34  ;;  %v813_v58 = vld [vmem:[%s1108_s29 + $0xe8] sm:$0xff]  ;;  %v532_v59 = vmax.f32 %v440_v42, %v441_v47  ;;  %v395_v60 = vadd.f32 %v807_v41, %v250_v35  ;;  %v814_v61 = vld [vmem:[%s1108_s29 + $0xf0] sm:$0xff]  ;;  %v815_v62 = vld [vmem:[%s1108_s29 + $0xf8] sm:$0xff]  ;;  %s714_s29 = sshll.u32 %s710_s18, 4  ;;  %s715_s29 = int_to_ptr.hbm [resolvable:$true] %s714_s29 }
  0x2d   : > { %530 = vmax.xlane.f32.xlu2 %v529_v45  ;;  %490 = vadd.xlane.f32.xlu0 %v489_v46  ;;  %v400_v63 = vadd.f32 %v812_v57, %v255_v49  ;;  %v499_v0 = vadd.f32 %v498_v52, %v399_v33  ;;  %v401_v2 = vadd.f32 %v813_v58, %v256_v50  ;;  %v550_v16 = vld [vmem:[%s1227_s1 + $0x18] sm:$0xff]  ;;  %v549_v24 = vld [vmem:[%s1227_s1 + $0x10] sm:$0xff]  ;;  %v556_v28 = vlaneseq  ;;  %s938_s22 = sshra.s32 %s715_s29, 4  ;;  %s939_s22 = int_to_ptr.hbm [resolvable:$true] %s938_s22 }
  0x2e   : > { %v492_v1 = vadd.f32 %v393_v54, %v392_v43  ;;  %v402_v3 = vadd.f32 %v814_v61, %v257_v51  ;;  %v533_v4 = vmax.f32 %v532_v59, %v442_v48  ;;  %v403_v5 = vadd.f32 %v815_v62, %v258_v56  ;;  %586 = vmatpush.msra.mxu0 %v550_v16  ;;  %v551_v59 = vld [vmem:[%s1228_s2] sm:$0x3]  ;;  %s940_s24 = scalar_lea.hbm %s939_s22, 1  ;;  %p945_p7 = scmp.lt.s32.totalorder %s939_s22, %s1229_s3 }
  0x2f   : > { %500 = vadd.xlane.f32.xlu1 %v499_v0  ;;  %v502_v7 = vadd.f32 %v401_v2, %v400_v63  ;;  %v448_v8 = vmax.f32 %v255_v49, %v812_v57  ;;  %v449_v9 = vmax.f32 %v256_v50, %v813_v58  ;;  %v537_v12 = vmax.f32 %v444_v37, %v445_v44  ;;  %p941_p4 = scmp.ne.s32.totalorder %s939_s22, %s940_s24  ;;  %p946_p8 = scmp.lt.s32.totalorder %s944_s4, %s940_s24 }
  0x30   : > { %v493_v6 = vadd.f32 %v492_v1, %v394_v55  ;;  %v534_v10 = vmax.f32 %v533_v4, %v443_v53  ;;  %v450_v18 = vmax.f32 %v257_v51, %v814_v61  ;;  %v447_v20 = vmax.f32 %v1132_v17, %v1140_v25  ;;  %620 = vmatpush.msra.mxu1 %v550_v16  ;;  %v548_v17 = vld [vmem:[%s1227_s1 + $0x8] sm:$0xff]  ;;  %v547_v25 = vld [vmem:[%s1227_s1] sm:$0xff] }
  0x31   : > { %v503_v14 = vadd.f32 %v502_v7, %v402_v3  ;;  %v542_v19 = vmax.f32 %v448_v8, %v449_v9  ;;  %v538_v21 = vmax.f32 %v537_v12, %v446_v11  ;;  %v451_v22 = vmax.f32 %v258_v56, %v815_v62  ;;  %587 = vmatpush.msra.mxu0 %v549_v24  ;;  %p942_p5 = pnand %p941_p4, %p1081_p9  ;;  %p947_p10 = por %p946_p8, %p945_p7 }
  0x32   : > { %v494_v13 = vadd.f32 %v493_v6, %v395_v60  ;;  %621 = vmatpush.msra.mxu1 %v549_v24  ;;  %v557_v32 = vand.u32 127, %v556_v28  ;;  %820 = vmatpush.msk.msra.mxu3 %vm633_vm4, %v551_v59 }
  0x33   : > { %v504_v15 = vadd.f32 %v503_v14, %v403_v5  ;;  %v543_v23 = vmax.f32 %v542_v19, %v450_v18  ;;  %v539_v26 = vmax.f32 %v538_v21, %v447_v20  ;;  %588 = vmatpush.msra.mxu0 %v548_v17  ;;  %818 = vmatpush.msk.msra.mxu2 %vm633_vm4, %v551_v59  ;;  %p943_p6 = pneg %p942_p5 }
  0x34   : > { %622 = vmatpush.msra.mxu1 %v548_v17  ;;  %v563_v34 = vadd.s32 4294967280, %v557_v32  ;;  %v559_v37 = vadd.s32 4294967288, %v557_v32  ;;  %v567_v39 = vadd.s32 4294967272, %v557_v32 }
  0x35   : > { %535 = vmax.xlane.f32.xlu2 %v534_v10  ;;  %495 = vadd.xlane.f32.xlu0 %v494_v13  ;;  %v544_v27 = vmax.f32 %v543_v23, %v451_v22  ;;  %p948_p13 = pnand %p947_p10, %p943_p6 }
  0x36   : > { %589 = vmatpush.msra.mxu0 %v547_v25  ;;  %623 = vmatpush.msra.mxu1 %v547_v25 }
  0x37   : > { %505 = vadd.xlane.f32.xlu1 %v504_v15 }
  0x3d   : > { %540 = vmax.xlane.f32.xlu0 %v539_v26 }
  0x3f   : > { %545 = vmax.xlane.f32.xlu1 %v544_v27 }
  0xa0   : > { %v491_v29 = vpop.xlane.xlu0 %490  ;;  %v531_v30 = vpop.xlane.xlu2 %530 }
  0xa1   : > { %v507_v33 = vmul.f32 0.0009765625, %v491_v29  ;;  %v599_v47 = vperm.slane %v531_v30, %v557_v32 }
  0xa2   : > { %v501_v31 = vpop.xlane.xlu1 %500 }
  0xa3   : > { %v509_v35 = vmul.f32 0.0009765625, %v501_v31  ;;  %v558_v40 = vperm.slane %v507_v33, %v557_v32 }
  0xa5   : > { %v564_v44 = vperm.slane %v509_v35, %v563_v34 }
  0xa8   : > { %v496_v36 = vpop.xlane.xlu0 %495  ;;  %v536_v41 = vpop.xlane.xlu2 %535 }
  0xa9   : > { %v508_v38 = vmul.f32 0.0009765625, %v496_v36  ;;  %v600_v48 = vperm.slane %v536_v41, %v559_v37 }
  0xaa   : > { %v506_v43 = vpop.xlane.xlu1 %505 }
  0xab   : > { %v560_v42 = vperm.slane %v508_v38, %v559_v37  ;;  %v510_v45 = vmul.f32 0.0009765625, %v506_v43  ;;  %v601_v54 = vsel %vm561_vm1, %v600_v48, %v599_v47 }
  0xad   : > { %v562_v46 = vsel %vm561_vm1, %v560_v42, %v558_v40  ;;  %v568_v49 = vperm.slane %v510_v45, %v567_v39 }
  0xae   : > { %v566_v50 = vsel %vm565_vm0, %v564_v44, %v562_v46 }
  0xaf   : > { %v570_v51 = vsel %vm569_vm2, %v568_v49, %v566_v50 }
  0xb0   : > { %v541_v52 = vpop.xlane.xlu0 %540  ;;  %816 = vmatmul.msk.f32.vlgmr.msra.gmra.mxu0 %vm571_vm3, %v570_v51 }
  0xb1   : > { %v602_v53 = vperm.slane %v541_v52, %v563_v34 }
  0xb2   : > { %v546_v55 = vpop.xlane.xlu1 %545 }
  0xb3   : > { %v603_v56 = vsel %vm565_vm0, %v602_v53, %v601_v54  ;;  %v604_v57 = vperm.slane %v546_v55, %v567_v39 }
  0xb5   : > { %v605_v58 = vsel %vm569_vm2, %v604_v57, %v603_v56 }
  0xb6   : > { %817 = vmatmul.msk.f32.vlgmr.msra.gmra.mxu1 %vm571_vm3, %v605_v58 }
 0x12d   : > { %v591_v60 = vpop.f32.mrf.mxu0 }
 0x12e   : > { %v594_v61 = vmax.f32 %v591_v60, 0.0 }
 0x130   : > { %821 = vmatmul.msk.f32.vlgmr.msra.gmra.mxu3 %vm629_vm5, %v594_v61 }
 0x133   : > { %v625_v62 = vpop.f32.mrf.mxu1 }
 0x134   : > { %v628_v63 = vmax.f32 %v625_v62, 0.0 }
 0x136   : > { %819 = vmatmul.msk.f32.vlgmr.msra.gmra.mxu2 %vm629_vm5, %v628_v63 }
 0x1b3   : > { %v677_v0 = vpop.f32.mrf.mxu3 }
 0x1b9   : > { %v654_v1 = vpop.f32.mrf.mxu2 }
 0x1ba   : > { %v678_v2 = vadd.f32 %v677_v0, %v654_v1 }
 0x1bc   : > { %v822_v3 = vmul.f32 -1.442695, %v678_v2 }
 0x1be   : > { %890 = vpow2.f32 %v822_v3 }
 0x1c4   : > { %v891_v4 = vpop.eup %890 }
 0x1c5   : > { %v683_v5 = vadd.f32 1.0, %v891_v4 }
 0x1c7   : > { %892 = vrcp.f32 %v683_v5  ;;  %v695_v9 = vand.u32 2147483648, %v683_v5  ;;  %v693_v11 = vand.u32 2147483647, %v683_v5  ;;  %vm689_vm7 = vweird.f32 %v683_v5 }
 0x1c9   : > { %v696_v13 = vor.u32 1.1754944e-38, %v695_v9  ;;  %vm694_vm10 = vcmp.eq.f32.partialorder %v693_v11, 8.507059e+37 }
 0x1cd   : > { %v893_v6 = vpop.eup %892 }
 0x1ce   : > { %v685_v7 = vmul.f32 %v893_v6, %v683_v5  ;;  %vm690_vm6 = vweird.f32 %v893_v6 }
 0x1cf   : > { %vm691_vm8 = vmor %vm689_vm7, %vm690_vm6 }
 0x1d0   : > { %v686_v8 = vsub.f32 1.0, %v685_v7 }
 0x1d2   : > { %v687_v10 = vmul.f32 %v893_v6, %v686_v8 }
 0x1d4   : > { %v688_v12 = vadd.f32 %v893_v6, %v687_v10 }
 0x1d6   : > { %v692_v14 = vsel %vm691_vm8, %v893_v6, %v688_v12 }
 0x1d7   : > { %v697_v15 = vsel %vm694_vm10, %v696_v13, %v692_v14 }
 0x1d8   : > { %700 = vst.msk [vmem:[%s205_s21] sm:$0x1] %vm699_vm9, %v697_v15 }
 0x1d9   : > { %951 = shalt.err (!%p948_p13)
}
 0x1da   : > { %828 = dma.vmem_to_hbm [thread:$0]  (%p1081_p9), %s713_s23, 16, %s715_s29, %s702_s15  }
 0x1db PF: > { %s726_s19 = sand.u32 1, %s986_s12   ;;  %p835_p0 = pnand %p794_p12, %p1088_p11 }
 0x1dc   : > { %s727_s7 = scalar_lea.sflag [#allocation6], %s726_s19 }
 0x1dd   : > { %p836_p1 = pneg %p835_p0 }
 0x1df   : > { %981 = dma.done.wait (%p836_p1), %s727_s7, 16  }
 0x1e0   : > { %983 = vsyncadd (%p836_p1), %s727_s7, 4294967280  ;;  %s19_s17 = sadd.s32 1, %s1006_s17   ;;  %s1234_s12 = smov %s990_s13 }
 0x1e1   : > { %p16_p2 = scmp.ge.s32.totalorder %s19_s17, 4   ;;  %s1235_s13 = smov %s994_s14 }
 0x1e2   : > { %s1236_s14 = smov %s1086_s26  ;;  %s1237_s15 = smov %s1002_s16 }
 0x1e3   : > { %s1238_s16 = smov %s1240_s20  ;;  %18 = sbr.rel (!%p16_p2) target bundleno = 6 (0x6), region = 86 }
 0x1e8   :  { %732 = vsyncpa [#allocation5], 1 }
 0x1e9   :  { %734 = vsyncpa [#allocation5 + $0x1], 1 }
 0x1ea   :  { %735 = vsyncpa [#allocation6], 1 }
 0x1eb   :  { %737 = vsyncpa [#allocation6 + $0x1], 1 }

</bundles_post_ra>
